<compile_context>
chip_gen: v7x
topology: tpu7x:2x2x1
jax: 0.10.0
libtpu: 0.0.40
codegen_flags: <defaults>
</compile_context>

<pallas_src>
import math

import jax
import jax.numpy as jnp
from jax import lax
from jax.experimental import pallas as pl
from jax.experimental.pallas import tpu as pltpu


# ----------------------------------------------------------------------------
# Kernels
# ----------------------------------------------------------------------------
def _lora_kernel_multi_k(h_ref, w_ref, b_ref, p_ref, up_ref, o_ref, acc_ref):
    """Grid (i, j, k); k is the contraction axis over in_features."""
    k = pl.program_id(2)
    nk = pl.num_programs(2)

    @pl.when(k == 0)
    def _zero():
        acc_ref[...] = jnp.zeros_like(acc_ref)

    # acc += h_tile @ org_w_tile.T  — contract last dims of both operands
    # (A @ B.T form); the (tn, tk) weight tile stays in PyTorch (out, in)
    # layout and reaches the MXU without an XLU transpose.
    acc_ref[...] += lax.dot_general(
        h_ref[...], w_ref[...],
        dimension_numbers=(((1,), (1,)), ((), ())),
        preferred_element_type=jnp.float32)

    # Epilogue: add the (already down-projected) LoRA term and bias once.
    @pl.when(k == nk - 1)
    def _epilogue():
        lora = lax.dot_general(
            p_ref[...], up_ref[...],
            dimension_numbers=(((1,), (1,)), ((), ())),
            preferred_element_type=jnp.float32)
        y = acc_ref[...] + lora + b_ref[...].astype(jnp.float32)
        o_ref[...] = y.astype(o_ref.dtype)


def _lora_kernel_single_k(h_ref, w_ref, b_ref, p_ref, up_ref, o_ref):
    """Grid (i, j); whole in_features in one tile — no accumulator scratch."""
    acc = lax.dot_general(
        h_ref[...], w_ref[...],
        dimension_numbers=(((1,), (1,)), ((), ())),
        preferred_element_type=jnp.float32)
    lora = lax.dot_general(
        p_ref[...], up_ref[...],
        dimension_numbers=(((1,), (1,)), ((), ())),
        preferred_element_type=jnp.float32)
    o_ref[...] = (acc + lora + b_ref[...].astype(jnp.float32)).astype(o_ref.dtype)


# ----------------------------------------------------------------------------
# Wrapper
# ----------------------------------------------------------------------------
def _round_up(x, m):
    return (x + m - 1) // m * m


def _maybe_pad2(x, rows, cols):
    pr, pc = rows - x.shape[0], cols - x.shape[1]
    if pr == 0 and pc == 0:
        return x
    return jnp.pad(x, ((0, pr), (0, pc)))


def _pick_tile(dim, max_tile, align):
    """`dim` is a multiple of `align`; return the largest tile <= max_tile
    that is a multiple of `align` and divides `dim` (so no extra padding)."""
    if dim <= max_tile:
        return dim
    t = (max_tile // align) * align
    while t > align:
        if dim % t == 0:
            return t
        t -= align
    return align


def lora_linear(h, org_weight, org_bias, down_weight, up_weight,
                *, tm_max=512, tn_max=512, tk_max=None):
    """h: (..., in_features) -> (..., out_features).

    org_weight: (out, in), org_bias: (out,) or None,
    down_weight: (rank, in), up_weight: (out, rank)  (PyTorch Linear layout).
    """
    in_features = h.shape[-1]
    out_features = org_weight.shape[0]
    rank = down_weight.shape[0]
    lead = h.shape[:-1]
    n = int(math.prod(lead)) if lead else 1

    dtype = h.dtype
    itemsize = jnp.dtype(dtype).itemsize
    h2 = h.reshape(n, in_features)

    # Mirror `org.weight.to(h)` and the torch type promotion of the merge.
    org_weight = org_weight.astype(dtype)
    down_weight = down_weight.astype(dtype)
    up_weight = up_weight.astype(dtype)
    if org_bias is None:
        bias2 = jnp.zeros((1, out_features), dtype)
    else:
        bias2 = org_bias.astype(dtype).reshape(1, out_features)

    # LoRA down-projection as a tiny XLA GEMM outside the kernel:
    #   p = h @ down.T, shape (n, rank).
    # Hoisting it removes the in-kernel j==0 serial dependence (both output
    # grid axes become megacore-parallel) and the per-step down-tile DMA.
    p = lax.dot_general(
        h2, down_weight,
        dimension_numbers=(((1,), (1,)), ((), ())),
        preferred_element_type=jnp.float32).astype(dtype)

    # ---- Tile / padding selection -------------------------------------------
    if tk_max is None:
        # Keep each double-buffered input tile around <= 2 MiB.
        tk_max = 2048 if itemsize <= 2 else 1024

    row_align = max(8, 32 // itemsize)          # dtype-aware sublane packing
    n_pad = _round_up(n, row_align)
    if n_pad <= tm_max:
        tm = n_pad                              # grid_i == 1: weights streamed once
    else:
        tm = tm_max
        n_pad = _round_up(n_pad, tm)

    out_pad = _round_up(out_features, 128)
    in_pad = _round_up(in_features, 128)
    rank_pad = _round_up(rank, 128)             # lane-dense LoRA epilogue
    tn = _pick_tile(out_pad, tn_max, 128)
    tk = _pick_tile(in_pad, tk_max, 128)
    nk = in_pad // tk

    # Padding is only materialized when a dim is not already aligned; padded
    # K columns are zero in both h and the weights (exact), padded rows /
    # out columns are sliced off below.
    h_p = _maybe_pad2(h2, n_pad, in_pad)
    w_p = _maybe_pad2(org_weight, out_pad, in_pad)
    b_p = _maybe_pad2(bias2, 1, out_pad)
    p_p = _maybe_pad2(p, n_pad, rank_pad)
    up_p = _maybe_pad2(up_weight, out_pad, rank_pad)

    flops = (2.0 * n_pad * in_pad * out_pad        # main matmul
             + 2.0 * n_pad * rank_pad * out_pad)   # LoRA up-projection
    bytes_accessed = (h_p.size + w_p.size + b_p.size + p_p.size + up_p.size
                      + n_pad * out_pad) * itemsize
    cost = pl.CostEstimate(flops=int(flops), transcendentals=0,
                           bytes_accessed=int(bytes_accessed))

    # VMEM budget: double-buffered input/output tiles + f32 accumulator.
    vmem_bytes = (2 * (tm * tk + tn * tk + tm * rank_pad + tn * rank_pad
                       + tn + tm * tn) * itemsize
                  + tm * tn * 4)
    vmem_limit = int(min(max(vmem_bytes * 3 // 2, 32 << 20), 56 << 20))

    if nk == 1:
        grid = (n_pad // tm, out_pad // tn)
        in_specs = [
            pl.BlockSpec((tm, tk), lambda i, j: (i, 0)),        # h (full K)
            pl.BlockSpec((tn, tk), lambda i, j: (j, 0)),        # org_weight
            pl.BlockSpec((1, tn), lambda i, j: (0, j)),         # bias
            pl.BlockSpec((tm, rank_pad), lambda i, j: (i, 0)),  # p = h @ down.T
            pl.BlockSpec((tn, rank_pad), lambda i, j: (j, 0)),  # up
        ]
        out_spec = pl.BlockSpec((tm, tn), lambda i, j: (i, j))
        kernel = _lora_kernel_single_k
        scratch = []
        dims = ("parallel", "parallel")
    else:
        grid = (n_pad // tm, out_pad // tn, nk)
        in_specs = [
            pl.BlockSpec((tm, tk), lambda i, j, k: (i, k)),        # h
            pl.BlockSpec((tn, tk), lambda i, j, k: (j, k)),        # org_weight
            pl.BlockSpec((1, tn), lambda i, j, k: (0, j)),         # bias
            pl.BlockSpec((tm, rank_pad), lambda i, j, k: (i, 0)),  # p
            pl.BlockSpec((tn, rank_pad), lambda i, j, k: (j, 0)),  # up
        ]
        out_spec = pl.BlockSpec((tm, tn), lambda i, j, k: (i, j))
        kernel = _lora_kernel_multi_k
        scratch = [pltpu.VMEM((tm, tn), jnp.float32)]   # f32 accumulator
        dims = ("parallel", "parallel", "arbitrary")    # k = reduction, last

    out = pl.pallas_call(
        kernel,
        out_shape=jax.ShapeDtypeStruct((n_pad, out_pad), dtype),
        grid=grid,
        in_specs=in_specs,
        out_specs=out_spec,
        scratch_shapes=scratch,
        compiler_params=pltpu.CompilerParams(
            dimension_semantics=dims,
            vmem_limit_bytes=vmem_limit),
        cost_estimate=cost,
    )(h_p, w_p, b_p, p_p, up_p)

    out = out[:n, :out_features]
    return out.reshape(*lead, out_features)


# ----------------------------------------------------------------------------
# Self-test
# ----------------------------------------------------------------------------
if __name__ == "__main__":
    # Small, deterministic synthetic setup consistent with the module's shapes.
    in_features, out_features, rank = 32, 64, 16
    batch, seq = 2, 8

    key = jax.random.PRNGKey(0)
    k_h, k_org_w, k_org_b, k_down, k_up = jax.random.split(key, 5)

    h = jax.random.normal(k_h, (batch, seq, in_features), dtype=jnp.float32)
    # "org" layer: Linear(in_features, out_features) with bias.
    org_weight = jax.random.normal(k_org_w, (out_features, in_features),
                                   dtype=jnp.float32) * 0.05
    org_bias = jax.random.normal(k_org_b, (out_features,),
                                 dtype=jnp.float32) * 0.05
    # LoRA params (Linear weights, bias=False): down (rank, in), up (out, rank).
    down_weight = jax.random.normal(k_down, (rank, in_features),
                                    dtype=jnp.float32) * 0.02
    up_weight = jax.random.normal(k_up, (out_features, rank),
                                  dtype=jnp.float32) * 0.02

    out = lora_linear(h, org_weight, org_bias, down_weight, up_weight)
    out = jax.block_until_ready(out)

    # Pure-JAX reference mirroring the torch forward exactly.
    final_w = org_weight + jnp.dot(up_weight, down_weight,
                                   precision=lax.Precision.HIGHEST)
    ref = jnp.dot(h, final_w.T, precision=lax.Precision.HIGHEST) + org_bias

    assert out.shape == (batch, seq, out_features)
    # Factored LoRA path differs from the merged-weight reference only by
    # accumulation order / MXU pass decomposition.
    assert jnp.allclose(out, ref, atol=2e-3, rtol=2e-3)

    print("KERNEL_OK")
</pallas_src>

<mosaic_0001>
module attributes {stable_mosaic.version = 11 : i64} {
  func.func @_lora_kernel_single_k(%arg0: i32, %arg1: i32, %arg2: memref<16x128xf32, #tpu.memory_space<vmem>>, %arg3: memref<128x128xf32, #tpu.memory_space<vmem>>, %arg4: memref<1x128xf32, #tpu.memory_space<vmem>>, %arg5: memref<16x128xf32, #tpu.memory_space<vmem>>, %arg6: memref<128x128xf32, #tpu.memory_space<vmem>>, %arg7: memref<16x128xf32, #tpu.memory_space<vmem>>) attributes {dimension_semantics = [#tpu.dimension_semantics<parallel>, #tpu.dimension_semantics<parallel>], iteration_bounds = array<i64: 1, 1>, scalar_prefetch = 0 : i64, scratch_operands = 0 : i64, tpu.core_type = #tpu.core_type<tc>, window_params = [{transform_indices = @transform_0, window_bounds = array<i64: 16, 128>}, {transform_indices = @transform_1, window_bounds = array<i64: 128, 128>}, {transform_indices = @transform_2, window_bounds = array<i64: 1, 128>}, {transform_indices = @transform_3, window_bounds = array<i64: 16, 128>}, {transform_indices = @transform_4, window_bounds = array<i64: 128, 128>}, {transform_indices = @transform_5, window_bounds = array<i64: 16, 128>}]} {
    %c0 = arith.constant 0 : index
    %c0_0 = arith.constant 0 : index
    %0 = vector.load %arg2[%c0, %c0_0] : memref<16x128xf32, #tpu.memory_space<vmem>>, vector<16x128xf32>
    %c0_1 = arith.constant 0 : index
    %c0_2 = arith.constant 0 : index
    %1 = vector.load %arg3[%c0_1, %c0_2] : memref<128x128xf32, #tpu.memory_space<vmem>>, vector<128x128xf32>
    %cst = arith.constant dense<0.000000e+00> : vector<16x128xf32>
    %2 = tpu.matmul %0, %1, %cst {dimension_numbers = #tpu.dot_dimension_numbers<[1], [1], [0], [0], [0, 0, 1, 0], [], []>} : vector<16x128xf32>, vector<128x128xf32>, vector<16x128xf32> -> vector<16x128xf32>
    %c0_3 = arith.constant 0 : index
    %c0_4 = arith.constant 0 : index
    %3 = vector.load %arg5[%c0_3, %c0_4] : memref<16x128xf32, #tpu.memory_space<vmem>>, vector<16x128xf32>
    %c0_5 = arith.constant 0 : index
    %c0_6 = arith.constant 0 : index
    %4 = vector.load %arg6[%c0_5, %c0_6] : memref<128x128xf32, #tpu.memory_space<vmem>>, vector<128x128xf32>
    %cst_7 = arith.constant dense<0.000000e+00> : vector<16x128xf32>
    %5 = tpu.matmul %3, %4, %cst_7 {dimension_numbers = #tpu.dot_dimension_numbers<[1], [1], [0], [0], [0, 0, 1, 0], [], []>} : vector<16x128xf32>, vector<128x128xf32>, vector<16x128xf32> -> vector<16x128xf32>
    %6 = arith.addf %2, %5 : vector<16x128xf32>
    %c0_8 = arith.constant 0 : index
    %c0_9 = arith.constant 0 : index
    %7 = vector.load %arg4[%c0_8, %c0_9] : memref<1x128xf32, #tpu.memory_space<vmem>>, vector<1x128xf32>
    %8 = vector.broadcast %7 : vector<1x128xf32> to vector<16x128xf32>
    %9 = arith.addf %6, %8 : vector<16x128xf32>
    %c0_10 = arith.constant 0 : index
    %c0_11 = arith.constant 0 : index
    %10 = vector.load %arg7[%c0_10, %c0_11] : memref<16x128xf32, #tpu.memory_space<vmem>>, vector<16x128xf32>
    tpu.vector_store %arg7[%c0_10, %c0_11], %9 {strides = array<i32>} : memref<16x128xf32, #tpu.memory_space<vmem>>, vector<16x128xf32>,
    return
  }
  func.func @transform_0(%arg0: i32, %arg1: i32) -> (i32, i32) {
    %c0_i32 = arith.constant 0 : i32
    %c0_i32_0 = arith.constant 0 : i32
    return %arg0, %c0_i32 : i32, i32
  }
  func.func @transform_1(%arg0: i32, %arg1: i32) -> (i32, i32) {
    %c0_i32 = arith.constant 0 : i32
    %c0_i32_0 = arith.constant 0 : i32
    return %arg1, %c0_i32 : i32, i32
  }
  func.func @transform_2(%arg0: i32, %arg1: i32) -> (i32, i32) {
    %c0_i32 = arith.constant 0 : i32
    %c0_i32_0 = arith.constant 0 : i32
    return %c0_i32, %arg1 : i32, i32
  }
  func.func @transform_3(%arg0: i32, %arg1: i32) -> (i32, i32) {
    %c0_i32 = arith.constant 0 : i32
    %c0_i32_0 = arith.constant 0 : i32
    return %arg0, %c0_i32 : i32, i32
  }
  func.func @transform_4(%arg0: i32, %arg1: i32) -> (i32, i32) {
    %c0_i32 = arith.constant 0 : i32
    %c0_i32_0 = arith.constant 0 : i32
    return %arg1, %c0_i32 : i32, i32
  }
  func.func @transform_5(%arg0: i32, %arg1: i32) -> (i32, i32) {
    %c0_i32 = arith.constant 0 : i32
    return %arg0, %arg1 : i32, i32
  }
}

</mosaic_0001>

<bundles_post_ra>
// kernel: tpu_custom_call.1
= control target key start
LH: loop header
LB: loop body
LE: loop exit
PB: predicated region body
PF: predicated region fallthrough
CT: control target
= control target key end

     0   :  { %10 = vsyncpa [#allocation3], 0  ;;  %s719_s0 = inlined_call_operand.hbm [shape: f32[16,128], index: 0, kind: input, shape index: {}]   ;;  %s720_s1 = inlined_call_operand.hbm [shape: f32[128,128], index: 1, kind: input, shape index: {}]   ;;  %s721_s2 = inlined_call_operand.vmem [shape: f32[1,128], index: 2, kind: input, shape index: {}]   ;;  %s722_s3 = inlined_call_operand.hbm [shape: f32[16,128], index: 3, kind: input, shape index: {}]   ;;  %s723_s4 = inlined_call_operand.hbm [shape: f32[128,128], index: 4, kind: input, shape index: {}]   ;;  %s724_s5 = inlined_call_operand.hbm [shape: f32[16,128], index: 5, kind: output, shape index: {}]  }
   0x1   :  { %11 = vsyncpa [#allocation6], 0 }
   0x2   :  { %12 = vsyncpa [#allocation9], 0 }
   0x3   :  { %13 = vsyncpa [#allocation4], 0  ;;  %s590_s18 = smov [#allocation5]   ;;  %s591_s20 = smov [#allocation2]  }
   0x4   :  { %s31_s19 = sshll.u32 %s590_s18, 4  ;;  %s19_s21 = sshll.u32 %s591_s20, 4  ;;  %s32_s19 = int_to_ptr.vmem [resolvable:$true] %s31_s19  ;;  %s627_s21 = int_to_ptr.vmem [resolvable:$true] %s19_s21 }
   0x5   :  { %s472_s24 = scalar_lea.hbm %s720_s1, 2048 }
   0x6   :  { %p473_p0 = scmp.ne.s32.totalorder %s720_s1, %s472_s24  ;;  %p476_p1 = scmp.lt.u32.totalorder %s472_s24, %s720_s1 }
   0x8   :  { %p478_p2 = pnand %p476_p1, %p473_p0 }
   0xa   :  { %481 = shalt.err (!%p478_p2)
}
   0xb   :  { %s482_s29 = scalar_lea.vmem %s32_s19, 2048  ;;  %p487_p4 = scmp.lt.s32.totalorder %s32_s19, %s32_s19 }
   0xc   :  { %p483_p3 = scmp.ne.s32.totalorder %s32_s19, %s482_s29  ;;  %p488_p5 = scmp.lt.s32.totalorder %s482_s29, %s482_s29 }
   0xe   :  { %p489_p6 = por %p488_p5, %p487_p4 }
  0x10   :  { %p490_p7 = pnand %p489_p6, %p483_p3 }
  0x12   :  { %493 = shalt.err (!%p490_p7)
}
  0x13   :  { %s592_s30 = smov 128   ;;  %s593_s6 = smov 8  }
  0x14   :  { %37 = dma.hbm_to_vmem [thread:$0]  %s720_s1, 2048, %s32_s19, [#allocation6], %s592_s30, %s592_s30, %s593_s6  }
  0x15   :  { %s494_s11 = scalar_lea.hbm %s719_s0, 256 }
  0x16   :  { %p495_p8 = scmp.ne.s32.totalorder %s719_s0, %s494_s11  ;;  %p498_p9 = scmp.lt.u32.totalorder %s494_s11, %s719_s0 }
  0x18   :  { %p500_p10 = pnand %p498_p9, %p495_p8 }
  0x1a   :  { %503 = shalt.err (!%p500_p10)
}
  0x1b   :  { %s504_s16 = scalar_lea.vmem %s627_s21, 256  ;;  %p509_p12 = scmp.lt.s32.totalorder %s627_s21, %s627_s21 }
  0x1c   :  { %p505_p11 = scmp.ne.s32.totalorder %s627_s21, %s504_s16  ;;  %p510_p13 = scmp.lt.s32.totalorder %s504_s16, %s504_s16 }
  0x1e   :  { %p511_p0 = por %p510_p13, %p509_p12 }
  0x20   :  { %p512_p1 = pnand %p511_p0, %p505_p11 }
  0x22   :  { %515 = shalt.err (!%p512_p1)
}
  0x23   :  { %25 = dma.hbm_to_vmem [thread:$0]  %s719_s0, 256, %s627_s21, [#allocation3], %s592_s30, %s592_s30, %s593_s6  }
  0x24   :  { %s594_s18 = smov [#allocation7]   ;;  %s595_s20 = smov [#allocation8]  }
  0x25   :  { %s45_s19 = sshll.u32 %s594_s18, 4  ;;  %s57_s22 = sshll.u32 %s595_s20, 4  ;;  %s46_s19 = int_to_ptr.vmem [resolvable:$true] %s45_s19  ;;  %s664_s22 = int_to_ptr.vmem [resolvable:$true] %s57_s22 }
  0x26   :  { %s516_s25 = scalar_lea.hbm %s722_s3, 256 }
  0x27   :  { %p517_p2 = scmp.ne.s32.totalorder %s722_s3, %s516_s25  ;;  %p520_p3 = scmp.lt.u32.totalorder %s516_s25, %s722_s3 }
  0x29   :  { %p522_p4 = pnand %p520_p3, %p517_p2 }
  0x2b   :  { %525 = shalt.err (!%p522_p4)
}
  0x2c   :  { %s526_s0 = scalar_lea.vmem %s46_s19, 256  ;;  %p531_p6 = scmp.lt.s32.totalorder %s46_s19, %s46_s19 }
  0x2d   :  { %p527_p5 = scmp.ne.s32.totalorder %s46_s19, %s526_s0  ;;  %p532_p7 = scmp.lt.s32.totalorder %s526_s0, %s526_s0 }
  0x2f   :  { %p533_p8 = por %p532_p7, %p531_p6 }
  0x31   :  { %p534_p9 = pnand %p533_p8, %p527_p5 }
  0x33   :  { %537 = shalt.err (!%p534_p9)
}
  0x34   :  { %51 = dma.hbm_to_vmem [thread:$0]  %s722_s3, 256, %s46_s19, [#allocation6], %s592_s30, %s592_s30, %s593_s6  }
  0x35   :  { %s538_s10 = scalar_lea.hbm %s723_s4, 2048 }
  0x36   :  { %p539_p10 = scmp.ne.s32.totalorder %s723_s4, %s538_s10  ;;  %p542_p11 = scmp.lt.u32.totalorder %s538_s10, %s723_s4 }
  0x38   :  { %p544_p12 = pnand %p542_p11, %p539_p10 }
  0x3a   :  { %547 = shalt.err (!%p544_p12)
}
  0x3b   :  { %s548_s15 = scalar_lea.vmem %s664_s22, 2048  ;;  %p553_p0 = scmp.lt.s32.totalorder %s664_s22, %s664_s22 }
  0x3c   :  { %p549_p13 = scmp.ne.s32.totalorder %s664_s22, %s548_s15  ;;  %p554_p1 = scmp.lt.s32.totalorder %s548_s15, %s548_s15 }
  0x3e   :  { %p555_p2 = por %p554_p1, %p553_p0 }
  0x40   :  { %p556_p3 = pnand %p555_p2, %p549_p13 }
  0x42   :  { %559 = shalt.err (!%p556_p3)
}
  0x43   :  { %63 = dma.hbm_to_vmem [thread:$0]  %s723_s4, 2048, %s664_s22, [#allocation9], %s592_s30, %s592_s30, %s593_s6  }
  0x44   :  { %582 = dma.done.wait [#allocation3], 256  }
  0x45   :  { %583 = vsyncadd [#allocation3], 4294967040 }
  0x46   :  { %584 = dma.done.wait [#allocation6], 2304  }
  0x47   :  { %585 = vsyncadd [#allocation6], 4294964992 }
  0x48   :  { %586 = dma.done.wait [#allocation9], 2048  }
  0x49   :  { %587 = vsyncadd [#allocation9], 4294965248  ;;  %v96_v0 = vld [vmem:[#allocation8] sm:$0xff]  ;;  %v97_v1 = vld [vmem:[#allocation8 + $0x8] sm:$0xff]  ;;  %s596_s17 = smov [#allocation10]  }
  0x4a   :  { %v78_v2 = vld [vmem:[#allocation5] sm:$0xff]  ;;  %v399_v3 = vpack.c.bf16 %v97_v1, %v96_v0  ;;  %v79_v4 = vld [vmem:[#allocation5 + $0x8] sm:$0xff]  ;;  %v80_v9 = vld [vmem:[#allocation5 + $0x10] sm:$0xff]  ;;  %s278_s18 = sshll.u32 %s596_s17, 4  ;;  %s279_s18 = int_to_ptr.vmem [resolvable:$true] %s278_s18 }
  0x4b   :  { %v98_v5 = vld [vmem:[#allocation8 + $0x10] sm:$0xff]  ;;  %v99_v6 = vld [vmem:[#allocation8 + $0x18] sm:$0xff]  ;;  %v431_v7 = vpack.c.bf16 %v79_v4, %v78_v2  ;;  %v81_v10 = vld [vmem:[#allocation5 + $0x18] sm:$0xff]  ;;  %s560_s19 = scalar_lea.vmem %s279_s18, 256  ;;  %p565_p5 = scmp.lt.s32.totalorder %s279_s18, %s279_s18 }
  0x4c   :  { %v403_v8 = vpack.c.bf16 %v99_v6, %v98_v5  ;;  %400 = vmatprep.subr.bf16.mxu1 %v399_v3  ;;  %v435_v11 = vpack.c.bf16 %v81_v10, %v80_v9  ;;  %v100_v12 = vld [vmem:[#allocation8 + $0x20] sm:$0xff]  ;;  %v101_v13 = vld [vmem:[#allocation8 + $0x28] sm:$0xff]  ;;  %v82_v14 = vld [vmem:[#allocation5 + $0x20] sm:$0xff]  ;;  %p561_p4 = scmp.ne.s32.totalorder %s279_s18, %s560_s19  ;;  %p566_p6 = scmp.lt.s32.totalorder %s560_s19, %s560_s19 }
  0x4d   :  { %432 = vmatprep.subr.bf16.mxu0 %v431_v7  ;;  %402 = vmatpush3.bf16.xpose.msra.mxu1 %v399_v3  ;;  %v83_v15 = vld [vmem:[#allocation5 + $0x28] sm:$0xff]  ;;  %v407_v16 = vpack.c.bf16 %v101_v13, %v100_v12  ;;  %v94_v18 = vld [vmem:[#allocation7] sm:$0xff]  ;;  %v76_v19 = vld [vmem:[#allocation2] sm:$0xff] }
  0x4e   :  { %434 = vmatpush3.bf16.xpose.msra.mxu0 %v431_v7  ;;  %404 = vmatprep.subr.bf16.mxu1 %v403_v8  ;;  %v439_v17 = vpack.c.bf16 %v83_v15, %v82_v14  ;;  %v102_v20 = vld [vmem:[#allocation8 + $0x30] sm:$0xff]  ;;  %v103_v21 = vld [vmem:[#allocation8 + $0x38] sm:$0xff]  ;;  %v84_v22 = vld [vmem:[#allocation5 + $0x30] sm:$0xff]  ;;  %p567_p7 = por %p566_p6, %p565_p5 }
  0x4f   :  { %436 = vmatprep.subr.bf16.mxu0 %v435_v11  ;;  %361 = vmatprep.mubr.f32.mxu1 %v94_v18  ;;  %v85_v23 = vld [vmem:[#allocation5 + $0x38] sm:$0xff]  ;;  %v411_v24 = vpack.c.bf16 %v103_v21, %v102_v20  ;;  %v104_v26 = vld [vmem:[#allocation8 + $0x40] sm:$0xff]  ;;  %v86_v28 = vld [vmem:[#allocation5 + $0x40] sm:$0xff] }
  0x50   :  { %396 = vmatprep.mubr.f32.mxu0 %v76_v19  ;;  %v443_v25 = vpack.c.bf16 %v85_v23, %v84_v22  ;;  %v105_v27 = vld [vmem:[#allocation8 + $0x48] sm:$0xff]  ;;  %v87_v29 = vld [vmem:[#allocation5 + $0x48] sm:$0xff]  ;;  %v106_v32 = vld [vmem:[#allocation8 + $0x50] sm:$0xff]  ;;  %p568_p8 = pnand %p567_p7, %p561_p4 }
  0x51   :  { %v415_v30 = vpack.c.bf16 %v105_v27, %v104_v26  ;;  %v447_v31 = vpack.c.bf16 %v87_v29, %v86_v28  ;;  %v107_v33 = vld [vmem:[#allocation8 + $0x58] sm:$0xff]  ;;  %v88_v34 = vld [vmem:[#allocation5 + $0x50] sm:$0xff]  ;;  %v89_v35 = vld [vmem:[#allocation5 + $0x58] sm:$0xff] }
  0x52   :  { %v419_v36 = vpack.c.bf16 %v107_v33, %v106_v32  ;;  %v451_v37 = vpack.c.bf16 %v89_v35, %v88_v34  ;;  %v108_v38 = vld [vmem:[#allocation8 + $0x60] sm:$0xff]  ;;  %v109_v39 = vld [vmem:[#allocation8 + $0x68] sm:$0xff]  ;;  %v90_v40 = vld [vmem:[#allocation5 + $0x60] sm:$0xff] }
  0x53   :  { %v91_v41 = vld [vmem:[#allocation5 + $0x68] sm:$0xff]  ;;  %v423_v42 = vpack.c.bf16 %v109_v39, %v108_v38  ;;  %v110_v44 = vld [vmem:[#allocation8 + $0x70] sm:$0xff]  ;;  %v92_v46 = vld [vmem:[#allocation5 + $0x70] sm:$0xff] }
  0x54   :  { %v455_v43 = vpack.c.bf16 %v91_v41, %v90_v40  ;;  %v111_v45 = vld [vmem:[#allocation8 + $0x78] sm:$0xff]  ;;  %v93_v47 = vld [vmem:[#allocation5 + $0x78] sm:$0xff]  ;;  %v292_v54 = vld [vmem:[%s721_s2] ss:$0 sm:$0xff] }
  0x55   :  { %406 = vmatpush3.bf16.xpose.msra.mxu1 %v403_v8  ;;  %v427_v48 = vpack.c.bf16 %v111_v45, %v110_v44  ;;  %v459_v49 = vpack.c.bf16 %v93_v47, %v92_v46  ;;  %v95_v50 = vld [vmem:[#allocation7 + $0x8] sm:$0xff]  ;;  %v77_v51 = vld [vmem:[#allocation2 + $0x8] sm:$0xff] }
  0x56   :  { %438 = vmatpush3.bf16.xpose.msra.mxu0 %v435_v11  ;;  %408 = vmatprep.subr.bf16.mxu1 %v407_v16 }
  0x57   :  { %440 = vmatprep.subr.bf16.mxu0 %v439_v17 }
  0x5d   :  { %410 = vmatpush3.bf16.xpose.msra.mxu1 %v407_v16 }
  0x5e   :  { %442 = vmatpush3.bf16.xpose.msra.mxu0 %v439_v17  ;;  %412 = vmatprep.subr.bf16.mxu1 %v411_v24 }
  0x5f   :  { %444 = vmatprep.subr.bf16.mxu0 %v443_v25 }
  0x65   :  { %414 = vmatpush3.bf16.xpose.msra.mxu1 %v411_v24 }
  0x66   :  { %446 = vmatpush3.bf16.xpose.msra.mxu0 %v443_v25  ;;  %416 = vmatprep.subr.bf16.mxu1 %v415_v30 }
  0x67   :  { %448 = vmatprep.subr.bf16.mxu0 %v447_v31 }
  0x6d   :  { %418 = vmatpush3.bf16.xpose.msra.mxu1 %v415_v30 }
  0x6e   :  { %450 = vmatpush3.bf16.xpose.msra.mxu0 %v447_v31  ;;  %420 = vmatprep.subr.bf16.mxu1 %v419_v36 }
  0x6f   :  { %452 = vmatprep.subr.bf16.mxu0 %v451_v37 }
  0x75   :  { %422 = vmatpush3.bf16.xpose.msra.mxu1 %v419_v36 }
  0x76   :  { %454 = vmatpush3.bf16.xpose.msra.mxu0 %v451_v37  ;;  %424 = vmatprep.subr.bf16.mxu1 %v423_v42 }
  0x77   :  { %456 = vmatprep.subr.bf16.mxu0 %v455_v43 }
  0x7d   :  { %426 = vmatpush3.bf16.xpose.msra.mxu1 %v423_v42 }
  0x7e   :  { %458 = vmatpush3.bf16.xpose.msra.mxu0 %v455_v43  ;;  %428 = vmatprep.subr.bf16.mxu1 %v427_v48 }
  0x7f   :  { %460 = vmatprep.subr.bf16.mxu0 %v459_v49 }
  0x85   :  { %430 = vmatpush3.bf16.xpose.msra.mxu1 %v427_v48 }
  0x86   :  { %462 = vmatpush3.bf16.xpose.msra.mxu0 %v459_v49 }
  0x8c   :  { %362 = vmatmul.mubr.f32.vlgmr.msra.gmra.mrb[0].mxu1 %v95_v50 }
  0x8d   :  { %397 = vmatmul.mubr.f32.vlgmr.msra.gmra.mrb[0].mxu0 %v77_v51 }
 0x15f   :  { %v363_v52 = vpop.f32.mrb[0].mxu1 }
 0x160   :  { %v398_v53 = vpop.f32.mrb[0].mxu0  ;;  %v178_v55 = vpop.f32.mrb[1].mxu1 }
 0x161   :  { %v259_v56 = vadd.f32 %v398_v53, %v363_v52  ;;  %v253_v57 = vpop.f32.mrb[1].mxu0 }
 0x162   :  { %v254_v58 = vadd.f32 %v253_v57, %v178_v55 }
 0x163   :  { %v270_v59 = vadd.f32 %v292_v54, %v259_v56 }
 0x164   :  { %v269_v60 = vadd.f32 %v292_v54, %v254_v58 }
 0x165   :  { %272 = vst [vmem:[#allocation10 + $0x8] sm:$0xff] %v270_v59 }
 0x166   :  { %271 = vst [vmem:[#allocation10] sm:$0xff] %v269_v60 }
 0x167   :  { %571 = shalt.err (!%p568_p8)
}
 0x168   :  { %s572_s22 = scalar_lea.hbm %s724_s5, 256 }
 0x169   :  { %p573_p9 = scmp.ne.s32.totalorder %s724_s5, %s572_s22  ;;  %p576_p10 = scmp.lt.u32.totalorder %s572_s22, %s724_s5 }
 0x16b   :  { %p578_p11 = pnand %p576_p10, %p573_p9 }
 0x16d   :  { %581 = shalt.err (!%p578_p11)
}
 0x16e   :  { %284 = dma.vmem_to_hbm [thread:$0]  %s279_s18, 256, %s724_s5, [#allocation4], %s592_s30, %s592_s30, %s593_s6  }
 0x16f   :  { %588 = dma.done.wait [#allocation4], 256  }
 0x170   :  { %589 = vsyncadd [#allocation4], 4294967040 }
 0x171   :  { %288 = vsyncpa [#allocation3], 1 }
 0x172   :  { %289 = vsyncpa [#allocation6], 1 }
 0x173   :  { %290 = vsyncpa [#allocation9], 1 }
 0x174   :  { %291 = vsyncpa [#allocation4], 1 }

</bundles_post_ra>
